<compile_context>
chip_gen: v5e
topology: v5e:2x2
jax: 0.10.0
libtpu: 0.0.40
codegen_flags: <defaults>
</compile_context>

<pallas_src>
import functools

import jax
import jax.numpy as jnp
from jax.experimental import pallas as pl
from jax.experimental.pallas import tpu as pltpu


# --------------------------------------------------------------------------- #
# helpers
# --------------------------------------------------------------------------- #

def _cdiv(a, b):
    return -(-a // b)


def _round_up(a, b):
    return _cdiv(a, b) * b


def _next_pow2(n):
    p = 1
    while p < n:
        p *= 2
    return p


def _sublane(dtype):
    # Native VMEM tile is (s, 128): s = 8 (4-byte), 16 (2-byte), 32 (1-byte).
    itemsize = jnp.dtype(dtype).itemsize
    return max(8, 8 * (4 // max(itemsize, 1)))


def _tiled_plane_bytes(h, w, dtype):
    """In-VMEM footprint of one (h, w) plane, including (s, 128) tile rounding."""
    s = _sublane(dtype)
    return (_round_up(max(h, 1), s) * _round_up(max(w, 1), 128)
            * jnp.dtype(dtype).itemsize)


def _vmem_capacity_bytes():
    try:
        info = pltpu.get_tpu_info()
        cap = getattr(info, "vmem_capacity_bytes", None)
        if cap:
            return int(cap)
    except Exception:
        pass
    return 64 * 1024 * 1024  # conservative (v7x-sized) fallback


# --------------------------------------------------------------------------- #
# kernel: whole (H, W) planes per block (main path)
# --------------------------------------------------------------------------- #

def _pad_plane_kernel(x_ref, o_ref, *, top, bottom, left, right, h, w, value):
    cb, h_out, w_out = o_ref.shape
    dt = o_ref.dtype
    if left == 0 and right == 0:
        # H-only pad: every store is full lane width (lane dense), no big fill.
        if top:
            o_ref[:, 0:top, :] = jnp.full((cb, top, w_out), value, dt)
        if bottom:
            o_ref[:, top + h:h_out, :] = jnp.full((cb, bottom, w_out), value, dt)
        o_ref[:, top:top + h, :] = x_ref[...]
    else:
        # W pad present: one lane-dense whole-tile fill, then the interior copy.
        # (Avoids four narrow masked strip stores; extra VMEM store is free
        #  relative to the HBM-bound writeback.)
        o_ref[...] = jnp.full((cb, h_out, w_out), value, dt)
        o_ref[:, top:top + h, left:left + w] = x_ref[...]


def _pad_whole_planes(x2, nc, h, w, h_out, w_out, pads, value,
                      block_budget, min_steps, vmem_limit, cost):
    top, bottom, left, right = pads
    per_plane = (_tiled_plane_bytes(h, w, x2.dtype)
                 + _tiled_plane_bytes(h_out, w_out, x2.dtype))
    max_cb = max(1, block_budget // per_plane)
    target_steps = min(nc, min_steps)
    cb = max(1, min(nc, max_cb, _cdiv(nc, target_steps)))
    grid_steps = _cdiv(nc, cb)

    kernel = functools.partial(
        _pad_plane_kernel, top=top, bottom=bottom, left=left, right=right,
        h=h, w=w, value=value)

    return pl.pallas_call(
        kernel,
        out_shape=jax.ShapeDtypeStruct((nc, h_out, w_out), x2.dtype),
        grid_spec=pltpu.PrefetchScalarGridSpec(
            num_scalar_prefetch=0,
            grid=(grid_steps,),
            in_specs=[pl.BlockSpec((cb, h, w), lambda i: (i, 0, 0))],
            out_specs=pl.BlockSpec((cb, h_out, w_out), lambda i: (i, 0, 0)),
        ),
        compiler_params=pltpu.CompilerParams(
            dimension_semantics=("parallel",),
            vmem_limit_bytes=vmem_limit,
        ),
        cost_estimate=cost,
    )(x2)


# --------------------------------------------------------------------------- #
# kernel: H-tiled fallback for planes too large for one block
# --------------------------------------------------------------------------- #

def _pad_h_tiled_kernel(*refs, th, tp, top, left, h, w, value, has_prev):
    if has_prev:
        curr_ref, prev_ref, o_ref = refs
    else:
        curr_ref, o_ref = refs
        prev_ref = None
    cb, _, w_out = o_ref.shape
    dt = o_ref.dtype
    j = pl.program_id(1)

    # Interior rows for output tile j come from the last `top` rows of the
    # small "prev" block plus the first `th - top` rows of the "curr" block.
    if has_prev:
        data = jnp.concatenate(
            [prev_ref[:, tp - top:tp, :], curr_ref[:, 0:th - top, :]], axis=1)
    else:
        data = curr_ref[...]

    # Mask rows that fall in the top/bottom pad (or past the array end).
    r = jax.lax.broadcasted_iota(jnp.int32, (1, th, 1), 1)
    in_row = j * th + r - top
    valid = (in_row >= 0) & (in_row < h)
    data = jnp.where(valid, data, jnp.asarray(value, dt))

    if left == 0 and w == w_out:
        o_ref[...] = data                                   # lane-dense store
    else:
        o_ref[...] = jnp.full((cb, th, w_out), value, dt)   # lane-dense fill
        o_ref[:, :, left:left + w] = data                   # interior columns


def _pad_h_tiled(x2, nc, h, w, h_out, w_out, pads, value,
                 block_budget, vmem_limit, cost):
    top, bottom, left, right = pads
    dtype = x2.dtype
    itemsize = jnp.dtype(dtype).itemsize
    s = _sublane(dtype)

    has_prev = top > 0
    tp = max(8, _next_pow2(top)) if has_prev else 0      # prev-block row depth
    align = max(32, tp, s)                                # pow2, multiple of tp & s

    row_bytes = (_round_up(w, 128) + _round_up(w_out, 128)) * itemsize
    th = max(align, (block_budget // max(row_bytes, 1)) // align * align)
    th = min(th, _round_up(h_out, align))
    th = max(th, _round_up(top + 1, align))               # ensure th > top

    g_h = _cdiv(h_out, th)
    g_curr = max(1, _cdiv(h, th))
    cb = 1
    # TODO(synk): if a single 32-row slab is still over budget (extremely wide
    # rows), a W-tiling axis would be needed as well.

    in_specs = [pl.BlockSpec(
        (cb, th, w),
        lambda i, j: (i, jnp.minimum(j, g_curr - 1), 0))]
    args = [x2]
    if has_prev:
        g_prev = max(1, _cdiv(h, tp))
        stride = th // tp
        in_specs.append(pl.BlockSpec(
            (cb, tp, w),
            lambda i, j: (i, jnp.minimum(jnp.maximum(j * stride - 1, 0),
                                         g_prev - 1), 0)))
        args.append(x2)

    kernel = functools.partial(
        _pad_h_tiled_kernel, th=th, tp=tp, top=top, left=left,
        h=h, w=w, value=value, has_prev=has_prev)

    return pl.pallas_call(
        kernel,
        out_shape=jax.ShapeDtypeStruct((nc, h_out, w_out), dtype),
        grid_spec=pltpu.PrefetchScalarGridSpec(
            num_scalar_prefetch=0,
            grid=(nc, g_h),
            in_specs=in_specs,
            out_specs=pl.BlockSpec((cb, th, w_out), lambda i, j: (i, j, 0)),
        ),
        compiler_params=pltpu.CompilerParams(
            dimension_semantics=("parallel", "arbitrary"),
            vmem_limit_bytes=vmem_limit,
        ),
        cost_estimate=cost,
    )(*args)


# --------------------------------------------------------------------------- #
# public wrapper (Pad2dMultiple.forward)
# --------------------------------------------------------------------------- #

def pad2d_multiple(x, multiple, mode="constant", value=0, *,
                   _block_budget_bytes=None):
    """Pallas implementation of Pad2dMultiple.forward (constant mode)."""
    if mode != "constant":
        # TODO(synk): reflect/replicate pad modes are not implemented.
        raise NotImplementedError("Only mode='constant' is implemented.")

    n, c, h, w = x.shape
    total_pad_w = (-w) % multiple
    total_pad_h = (-h) % multiple
    left = total_pad_w // 2
    right = total_pad_w - left
    top = total_pad_h // 2
    bottom = total_pad_h - top
    h_out = h + total_pad_h
    w_out = w + total_pad_w

    if total_pad_h == 0 and total_pad_w == 0:
        return x  # nothing to pad

    # Always bake the pad value as a plain Python scalar (never a jax.Array).
    value = float(value) if jnp.issubdtype(x.dtype, jnp.floating) else int(value)

    nc = n * c
    x2 = x.reshape(nc, h, w)
    itemsize = jnp.dtype(x.dtype).itemsize

    # Generation-aware budgets (v7x: 64 MiB VMEM; v5e/v6e: 128 MiB).
    vmem_cap = _vmem_capacity_bytes()
    if vmem_cap <= 64 * 1024 * 1024:          # v7x-class
        block_budget = 13 * 1024 * 1024       # in+out per block (x2 when double-buffered)
        vmem_limit = 48 * 1024 * 1024
        min_steps = 4                         # >= 2 steps per TensorCore
    else:                                     # v5e / v6e
        block_budget = 24 * 1024 * 1024
        vmem_limit = 100 * 1024 * 1024
        min_steps = 2                         # just enough for pipeline overlap
    if _block_budget_bytes is not None:
        block_budget = int(_block_budget_bytes)

    cost = pl.CostEstimate(
        flops=0, transcendentals=0,
        bytes_accessed=(nc * h * w + nc * h_out * w_out) * itemsize)

    pads = (top, bottom, left, right)
    per_plane = (_tiled_plane_bytes(h, w, x.dtype)
                 + _tiled_plane_bytes(h_out, w_out, x.dtype))

    if per_plane <= block_budget:
        out2 = _pad_whole_planes(x2, nc, h, w, h_out, w_out, pads, value,
                                 block_budget, min_steps, vmem_limit, cost)
    else:
        out2 = _pad_h_tiled(x2, nc, h, w, h_out, w_out, pads, value,
                            block_budget, vmem_limit, cost)

    return out2.reshape(n, c, h_out, w_out)


# --------------------------------------------------------------------------- #
# reference + tests
# --------------------------------------------------------------------------- #

def _reference_pad(x, multiple, value):
    _, _, h, w = x.shape
    tw = (-w) % multiple
    th = (-h) % multiple
    lw, lh = tw // 2, th // 2
    return jnp.pad(x, ((0, 0), (0, 0), (lh, th - lh), (lw, tw - lw)),
                   mode="constant", constant_values=value)


if __name__ == "__main__":
    key = jax.random.PRNGKey(0)

    # 1) Base case: both H and W get (asymmetric) padding.
    N, C, H, W = 2, 4, 13, 10
    x = jax.random.normal(key, (N, C, H, W), dtype=jnp.float32)
    out = jax.block_until_ready(pad2d_multiple(x, 8, value=0.0))
    ref = _reference_pad(x, 8, 0.0)
    assert out.shape == ref.shape, (out.shape, ref.shape)
    assert jnp.allclose(out, ref), "mismatch (multiple=8)"

    # 2) Non-zero pad value, different multiple.
    out2 = jax.block_until_ready(pad2d_multiple(x, 4, value=-1.5))
    ref2 = _reference_pad(x, 4, -1.5)
    assert out2.shape == ref2.shape and jnp.allclose(out2, ref2), "mismatch (multiple=4)"

    # 3) Exercise the H-tiled fallback path (forced via a tiny block budget).
    x3 = jax.random.normal(jax.random.PRNGKey(0), (1, 3, 45, 70), dtype=jnp.float32)
    out3 = jax.block_until_ready(
        pad2d_multiple(x3, 16, value=2.0, _block_budget_bytes=32 * 1024))
    ref3 = _reference_pad(x3, 16, 2.0)
    assert out3.shape == ref3.shape and jnp.allclose(out3, ref3), "mismatch (H-tiled)"

    # 4) H-only padding (W already a multiple) -> lane-dense row-range path.
    x4 = jax.random.normal(jax.random.PRNGKey(0), (1, 2, 13, 16), dtype=jnp.float32)
    out4 = jax.block_until_ready(pad2d_multiple(x4, 8, value=0.5))
    ref4 = _reference_pad(x4, 8, 0.5)
    assert out4.shape == ref4.shape and jnp.allclose(out4, ref4), "mismatch (H-only)"

    print("KERNEL_OK")
</pallas_src>

<mosaic_0001>
module attributes {stable_mosaic.version = 11 : i64} {
  func.func @_pad_plane_kernel(%arg0: i32, %arg1: memref<2x13x10xf32, #tpu.memory_space<vmem>>, %arg2: memref<2x16x16xf32, #tpu.memory_space<vmem>>) attributes {dimension_semantics = [#tpu.dimension_semantics<parallel>], iteration_bounds = array<i64: 4>, scalar_prefetch = 0 : i64, scratch_operands = 0 : i64, tpu.core_type = #tpu.core_type<tc>, window_params = [{transform_indices = @transform_0, window_bounds = array<i64: 2, 13, 10>}, {transform_indices = @transform_1, window_bounds = array<i64: 2, 16, 16>}]} {
    %cst = arith.constant 0.000000e+00 : f32
    %0 = vector.broadcast %cst : f32 to vector<2x16x16xf32>
    %c0 = arith.constant 0 : index
    %c0_0 = arith.constant 0 : index
    %c0_1 = arith.constant 0 : index
    %1 = vector.load %arg2[%c0, %c0_0, %c0_1] : memref<2x16x16xf32, #tpu.memory_space<vmem>>, vector<2x16x16xf32>
    tpu.vector_store %arg2[%c0, %c0_0, %c0_1], %0 {strides = array<i32>} : memref<2x16x16xf32, #tpu.memory_space<vmem>>, vector<2x16x16xf32>,
    %c0_2 = arith.constant 0 : index
    %c0_3 = arith.constant 0 : index
    %c0_4 = arith.constant 0 : index
    %2 = vector.load %arg1[%c0_2, %c0_3, %c0_4] : memref<2x13x10xf32, #tpu.memory_space<vmem>>, vector<2x13x10xf32>
    %c0_5 = arith.constant 0 : index
    %c1 = arith.constant 1 : index
    %c3 = arith.constant 3 : index
    %3 = vector.load %arg2[%c0_5, %c1, %c3] : memref<2x16x16xf32, #tpu.memory_space<vmem>>, vector<2x13x10xf32>
    tpu.vector_store %arg2[%c0_5, %c1, %c3], %2 {strides = array<i32>} : memref<2x16x16xf32, #tpu.memory_space<vmem>>, vector<2x13x10xf32>,
    return
  }
  func.func @transform_0(%arg0: i32) -> (i32, i32, i32) {
    %c0_i32 = arith.constant 0 : i32
    %c0_i32_0 = arith.constant 0 : i32
    %c0_i32_1 = arith.constant 0 : i32
    return %arg0, %c0_i32, %c0_i32_0 : i32, i32, i32
  }
  func.func @transform_1(%arg0: i32) -> (i32, i32, i32) {
    %c0_i32 = arith.constant 0 : i32
    %c0_i32_0 = arith.constant 0 : i32
    %c0_i32_1 = arith.constant 0 : i32
    return %arg0, %c0_i32, %c0_i32_0 : i32, i32, i32
  }
}

</mosaic_0001>

<bundles_post_ra>
// kernel: tpu_custom_call.1
= control target key start
LH: loop header
LB: loop body
LE: loop exit
PB: predicated region body
PF: predicated region fallthrough
CT: control target
= control target key end

     0   :  { %6 = vsyncpa [#allocation3], 0  ;;  %s468_s0 = inlined_call_operand.vmem [shape: f32[8,13,10], index: 0, kind: input, shape index: {}]   ;;  %s469_s1 = inlined_call_operand.hbm [shape: f32[8,16,16], index: 1, kind: output, shape index: {}]  }
   0x1   :  { %8 = vsyncpa [#allocation3 + $0x1], 0  ;;  %s369_s6 = smov 0   ;;  %s371_s7 = smov 0  }
   0x2   :  { %s373_s8 = smov 0   ;;  %s375_s9 = smov 0  }
   0x3 LB: > { %s390_s10 = sadd.s32 4294967295, %s353_s9   ;;  %s231_s11 = sadd.s32 4294967294, %s353_s9   ;;  %s353_s9 = sphi %s375_s9, %s475_s9   ;;  %s349_s8 = sphi %s373_s8, %s474_s8   ;;  %s345_s7 = sphi %s371_s7, %s473_s7   ;;  %s341_s6 = sphi %s369_s6, %s472_s6  }
   0x4   : > { %s394_s12 = sadd.s32 1, %s353_s9   ;;  %s47_s13 = sadd.s32 1, %s349_s8 }
   0x5   : > { %s44_s14 = ssub.s32 %s353_s9, %s394_s12  ;;  %p57_p0 = scmp.ne.s32.totalorder %s349_s8, %s345_s7 }
   0x6   : > { %p45_p1 = scmp.eq.s32.totalorder %s44_s14, 0  ;;  %p58_p2 = scmp.eq.s32.totalorder %s390_s10, 3 }
   0x7   : > { %p63_p3 = scmp.ne.s32.totalorder %s345_s7, %s341_s6  ;;  %p64_p4 = scmp.eq.s32.totalorder %s231_s11, 3 }
   0x8   : > { %s405_s15 = scalar_select %p45_p1, %s349_s8, %s47_s13  }
   0x9   : > { %p407_p5 = por %p58_p2, %p57_p0  ;;  %p411_p6 = por %p64_p4, %p63_p3 }
   0xa   : > { %p234_p7 = scmp.ge.s32.totalorder %s353_s9, 1  ;;  %p92_p8 = scmp.lt.s32.totalorder %s353_s9, 5 }
   0xc   : > { %p93_p9 = pnand %p234_p7, %p92_p8 }
   0xd   : > { %s236_s18 = sshll.u32 (!%p93_p9), %s390_s10, 1  ;;  %s110_s19 = sand.u32 (!%p93_p9), 1, %s345_s7  }
   0xe   : > { %96 = sbr.rel (%p93_p9) target bundleno = 151 (0x97), region = 24  ;;  %p114_p10 = scmp.lt.s32.totalorder (!%p93_p9), %s236_s18, 7 }
   0xf   : > { %s235_s20 = sshll.u32 (!%p93_p9), %s110_s19, 5  ;;  %s356_s26 = smov (!%p93_p9), 3  }
  0x10   : > { %s421_s22 = scalar_lea.vmem (!%p93_p9), [#allocation2], %s235_s20  ;;  %s247_s27 = sshll.u32 (!%p93_p9), %s390_s10, 5 }
  0x11   : > { %s165_s30 = scalar_lea.hbm (!%p93_p9), %s469_s1, %s247_s27  ;;  %s166_s2 = sshll.u32 (!%p93_p9), %s421_s22, 4  ;;  %s167_s2 = int_to_ptr.vmem [resolvable:$true] %s166_s2 }
  0x12   : > { %s168_s3 = sshll.u32 (!%p93_p9), %s165_s30, 4  ;;  %s153_s4 = scalar_lea.sflag (!%p93_p9), [#allocation3], %s110_s19  ;;  %s169_s3 = int_to_ptr.hbm [resolvable:$true] %s168_s3 }
  0x13   : > { %vm121_vm0 = vcmask 130048   ;;  %s477_s18 = smov (!%p114_p10, %s236_s18), 7  ;;  %v355_v0 = vmov 0.0   ;;  %vm146_vm1 = vcmask 105496   ;;  %vm148_vm2 = vcmask 102424   ;;  %s305_s5 = sshra.s32 %s169_s3, 4  ;;  %s306_s5 = int_to_ptr.hbm [resolvable:$true] %s305_s5 }
  0x14   : > { %s245_s21 = sshll.u32 %s477_s18, 4  ;;  %124 = vst.msk [vmem:[%s421_s22 + $0x10] sm:$0xff] %vm121_vm0, %v355_v0  ;;  %s307_s10 = scalar_lea.hbm %s306_s5, 32 }
  0x15   : > { %s118_s25 = scalar_lea.vmem %s468_s0, %s245_s21  ;;  %125 = vst.msk [vmem:[%s421_s22 + $0x18] sm:$0xff] %vm121_vm0, %v355_v0  ;;  %p308_p11 = scmp.ne.s32.totalorder %s306_s5, %s307_s10 }
  0x16   : > { %v128_v1 = vld [vmem:[%s118_s25 + $0x10] sm:$0xff]  ;;  %v126_v2 = vld [vmem:[%s118_s25] sm:$0xff]  ;;  %122 = vst.msk [vmem:[%s421_s22] sm:$0xff] %vm121_vm0, %v355_v0  ;;  %v129_v3 = vld [vmem:[%s118_s25 + $0x18] sm:$0x1f]  ;;  %s311_s14 = scalar_lea.hbm %s469_s1, 128  ;;  %p312_p0 = scmp.lt.s32.totalorder %s306_s5, %s469_s1 }
  0x17   : > { %138 = vrot.lane.b32.xlu1 %v128_v1, %s356_s26  ;;  %134 = vrot.lane.b32.xlu0 %v126_v2, %s356_s26  ;;  %123 = vst.msk [vmem:[%s421_s22 + $0x8] sm:$0xff] %vm121_vm0, %v355_v0  ;;  %v127_v4 = vld [vmem:[%s118_s25 + $0x8] sm:$0x1f]  ;;  %p309_p12 = pnand %p308_p11, %p407_p5  ;;  %p313_p1 = scmp.lt.s32.totalorder %s311_s14, %s307_s10 }
  0x19   : > { %p310_p13 = pneg %p309_p12  ;;  %p314_p2 = por %p313_p1, %p312_p0 }
  0x1b   : > { %p315_p3 = pnand %p314_p2, %p310_p13 }
  0x1f   : > { %140 = vrot.lane.b32.xlu1 %v129_v3, %s356_s26  ;;  %136 = vrot.lane.b32.xlu0 %v127_v4, %s356_s26 }
  0x89   : > { %v139_v5 = vpop.permute.xlu1 %138  ;;  %v135_v6 = vpop.permute.xlu0 %134 }
  0x8a   : > { %150 = vst.msk [vmem:[%s421_s22 + $0x11] sm:$0xff] %vm146_vm1, %v139_v5 }
  0x8b   : > { %147 = vst.msk [vmem:[%s421_s22 + $0x1] sm:$0xff] %vm146_vm1, %v135_v6 }
  0x91   : > { %v141_v7 = vpop.permute.xlu1 %140  ;;  %v137_v8 = vpop.permute.xlu0 %136 }
  0x92   : > { %151 = vst.msk [vmem:[%s421_s22 + $0x19] sm:$0x1f] %vm148_vm2, %v141_v7 }
  0x93   : > { %149 = vst.msk [vmem:[%s421_s22 + $0x9] sm:$0x1f] %vm148_vm2, %v137_v8 }
  0x94   : > { %318 = shalt.err (!%p315_p3)
}
  0x95   : > { %s357_s19 = smov 128   ;;  %s358_s21 = smov 8  }
  0x96   : > { %248 = dma.vmem_to_hbm [thread:$0]  (%p407_p5), %s167_s2, 512, %s169_s3, %s153_s4, %s357_s19, %s357_s19, %s358_s21  }
  0x97 PF: > { %p254_p4 = scmp.ge.s32.totalorder %s353_s9, 2  ;;  %s183_s22 = sand.u32 1, %s341_s6  }
  0x98   : > { %s184_s23 = scalar_lea.sflag [#allocation3], %s183_s22 }
  0x99   : > { %p251_p7 = pnand %p254_p4, %p411_p6 }
  0x9b   : > { %p252_p8 = pneg %p251_p7 }
  0x9d   : > { %336 = dma.done.wait (%p252_p8), %s184_s23, 512  }
  0x9e   : > { %338 = vsyncadd (%p252_p8), %s184_s23, 4294966784  ;;  %p11_p9 = scmp.ge.s32.totalorder %s394_s12, 6   ;;  %s472_s6 = smov %s345_s7 }
  0x9f   : > { %s473_s7 = smov %s349_s8  ;;  %s474_s8 = smov %s405_s15 }
  0xa0   : > { %s475_s9 = smov %s394_s12  ;;  %13 = sbr.rel (!%p11_p9) target bundleno = 3 (0x3), region = 59 }
  0xa5   :  { %190 = vsyncpa [#allocation3], 1 }
  0xa6   :  { %192 = vsyncpa [#allocation3 + $0x1], 1 }

</bundles_post_ra>
